<compile_context>
chip_gen: v7x
topology: tpu7x:2x2x1
jax: 0.10.0
libtpu: 0.0.40
codegen_flags: <defaults>
</compile_context>

<pallas_src>
import functools

import jax
import jax.numpy as jnp
from jax.experimental import pallas as pl
from jax.experimental.pallas import tpu as pltpu


def _round_up(x, m):
    return ((x + m - 1) // m) * m


def _hinge_kernel_packed(out_ref, y_ref, e_ref, et_ref, *rest,
                         margin, p, C, has_weight, acc_precision):
    """k > 1 samples packed side-by-side along the lane axis (W = k*C)."""
    if has_weight:
        w_ref, partial_ref = rest
    else:
        (partial_ref,) = rest

    out = out_ref[...].astype(jnp.float32)             # (PB, W) cast on the tile
    PB, W = out.shape
    E = e_ref[...]                                      # (k, W) resident 0/1 f32
    Et = et_ref[...]                                    # (W, k) resident 0/1 f32
    y_f = y_ref[...].astype(jnp.float32)                # (PB, k) small ints (exact)

    # (1, W) column constant; broadcasts against (PB, W) in the compare.
    lane_mod = (jax.lax.broadcasted_iota(jnp.int32, (1, W), 1) % C).astype(jnp.float32)

    # Broadcast each sample's label over its C lanes. Exact at DEFAULT precision:
    # labels < 128 are bf16-exact, E is 0/1, one nonzero product per output.
    target = jnp.dot(y_f, E, preferred_element_type=jnp.float32,
                     precision=jax.lax.Precision.DEFAULT)            # (PB, W)
    onehot = lane_mod == target                                      # true-class mask

    masked = jnp.where(onehot, out, 0.0)
    # Factored block-diagonal matmul (Bm = Et @ E): segmented per-sub-block sum,
    # then broadcast back.  One nonzero product per output -> exact at the
    # chosen precision (DEFAULT for bf16 inputs, HIGHEST for f32 inputs).
    sub = jnp.dot(masked, Et, preferred_element_type=jnp.float32,
                  precision=acc_precision)                           # (PB, k)
    out_y = jnp.dot(sub, E, preferred_element_type=jnp.float32,
                    precision=acc_precision)                         # (PB, W)

    loss = out - out_y + margin
    loss = jnp.where(onehot, 0.0, loss)                 # loss[arange, y] = 0
    loss = jnp.maximum(loss, 0.0)                       # loss[loss < 0] = 0
    if p != 1:
        loss = loss * loss if p == 2 else loss ** p
    if has_weight:
        loss = loss * w_ref[...]                        # (1, W) broadcast over rows

    # Reduce only the sublane axis in-kernel; the tiny cross-lane / cross-block
    # reduction happens in JAX.
    partial_ref[...] = jnp.sum(loss, axis=0, keepdims=True)


def _hinge_kernel_unpacked(out_ref, y_ref, *rest, margin, p, has_weight):
    """k == 1: one sample per row, classes on the lane axis. No MXU needed."""
    if has_weight:
        w_ref, partial_ref = rest
    else:
        (partial_ref,) = rest

    out = out_ref[...].astype(jnp.float32)              # (PB, C)
    PB, W = out.shape
    y = y_ref[...]                                       # (PB, 1) int32

    lane = jax.lax.broadcasted_iota(jnp.int32, (1, W), 1)   # (1, W) column constant
    onehot = lane == y                                   # (PB, W) true-class mask
    masked = jnp.where(onehot, out, 0.0)
    out_y = jnp.sum(masked, axis=1, keepdims=True)       # (PB, 1) true-class score

    loss = out - out_y + margin
    loss = jnp.where(onehot, 0.0, loss)
    loss = jnp.maximum(loss, 0.0)
    if p != 1:
        loss = loss * loss if p == 2 else loss ** p
    if has_weight:
        loss = loss * w_ref[...]

    partial_ref[...] = jnp.sum(loss, axis=0, keepdims=True)


def multi_class_hinge_loss(output, y, *, p=1, margin=1.0, weight=None,
                           size_average=True, block_rows=None,
                           block_bytes=4 << 20):
    """output: (N, C) float (any float dtype), y: (N,) int labels. Returns scalar."""
    N, C = output.shape
    in_dtype = output.dtype                  # keep HBM dtype, cast in-kernel
    itemsize = jnp.dtype(in_dtype).itemsize

    # Lane packing factor: pack k samples side-by-side when C divides 128.
    k = 128 // C if (C < 128 and 128 % C == 0) else 1
    W = k * C

    # Packed-sublane multiple of the input dtype (f32: 8, bf16: 16, 1-byte: 32).
    sub_mult = 8 * max(1, 4 // max(1, itemsize))

    # Per-packed-row VMEM bytes: lane-padded data tile + lane-padded int32 label
    # tile (the label block (pb, k) pads to 128 lanes in VMEM -> 512 B/row).
    data_row_bytes = _round_up(W, 128) * itemsize
    label_row_bytes = 128 * 4
    row_bytes = data_row_bytes + label_row_bytes

    rows_needed = -(-N // k)
    rows_min = _round_up(rows_needed, sub_mult)
    if block_rows is None:
        pb = (block_bytes // row_bytes) // sub_mult * sub_mult
        pb = max(sub_mult, min(pb, 16384))
    else:
        pb = max(sub_mult, _round_up(block_rows, sub_mult))
    pb = min(pb, rows_min)                    # tiny problems -> few grid steps
    # Prefer >= 2 grid steps when the problem allows it so both v7x TensorCores
    # get work (the grid axis is "parallel"); no-op perf-wise on v5e/v6e.
    if block_rows is None and pb >= rows_min and rows_min >= 2 * sub_mult:
        pb = _round_up(-(-rows_needed // 2), sub_mult)
    G = -(-rows_needed // pb)
    R = G * pb
    N_pad = R * k

    # Padded rows: value -(margin+1) with label -1 contributes exactly 0 loss.
    out_pad = output
    y_pad = y.astype(jnp.int32)
    if N_pad != N:
        out_pad = jnp.pad(output, ((0, N_pad - N), (0, 0)),
                          constant_values=-(float(margin) + 1.0))
        y_pad = jnp.pad(y_pad, (0, N_pad - N), constant_values=-1)

    has_weight = weight is not None
    is_bf16 = jnp.dtype(in_dtype) == jnp.dtype(jnp.bfloat16)
    # DEFAULT is lossless only when the HBM values are already bf16; keep f32
    # inputs exact with HIGHEST (small matmuls, fully hidden under the DMA).
    acc_precision = (jax.lax.Precision.DEFAULT if is_bf16
                     else jax.lax.Precision.HIGHEST)

    if k == 1:
        out_p = out_pad                                  # (R, C)
        y_p = y_pad.reshape(R, 1)
        inputs = [out_p, y_p]
        in_specs = [
            pl.BlockSpec((pb, W), lambda i: (i, 0)),
            pl.BlockSpec((pb, 1), lambda i: (i, 0)),
        ]
        kernel = functools.partial(_hinge_kernel_unpacked, margin=float(margin),
                                   p=p, has_weight=has_weight)
    else:
        out_p = out_pad.reshape(R, W)
        y_p = y_pad.reshape(R, k)
        # Hoisted constants: E[j, l] = 1 iff lane l belongs to sub-block j.
        col = jnp.arange(W, dtype=jnp.int32)
        row = jnp.arange(k, dtype=jnp.int32)[:, None]
        E = (col // C == row).astype(jnp.float32)        # (k, W)
        Et = E.T                                         # (W, k)
        inputs = [out_p, y_p, E, Et]
        in_specs = [
            pl.BlockSpec((pb, W), lambda i: (i, 0)),
            pl.BlockSpec((pb, k), lambda i: (i, 0)),
            pl.BlockSpec((k, W), lambda i: (0, 0)),      # resident constant
            pl.BlockSpec((W, k), lambda i: (0, 0)),      # resident constant
        ]
        kernel = functools.partial(_hinge_kernel_packed, margin=float(margin),
                                   p=p, C=C, has_weight=has_weight,
                                   acc_precision=acc_precision)

    if has_weight:
        w = jnp.asarray(weight, dtype=jnp.float32).reshape(1, C)
        if k > 1:
            w = jnp.tile(w, (1, k))           # replicate per packed sub-block
        inputs.append(w)
        in_specs.append(pl.BlockSpec((1, W), lambda i: (0, 0)))   # resident

    partials = pl.pallas_call(
        kernel,
        out_shape=jax.ShapeDtypeStruct((G, W), jnp.float32),
        grid_spec=pltpu.PrefetchScalarGridSpec(
            num_scalar_prefetch=0,
            grid=(G,),
            in_specs=in_specs,
            out_specs=pl.BlockSpec((1, W), lambda i: (i, 0)),
        ),
        compiler_params=pltpu.CompilerParams(
            dimension_semantics=("parallel",),        # independent blocks (megacore)
            vmem_limit_bytes=32 * 1024 * 1024,        # > v5e 16 MiB default, < v7x 64 MiB
        ),
    )(*inputs)

    total = jnp.sum(partials, dtype=jnp.float32)
    if size_average:
        total = total / jnp.float32(N)
    return total


def _reference(output, y, p=1, margin=1.0, weight=None, size_average=True):
    N, C = output.shape
    out_y = output[jnp.arange(N), y].reshape(-1, 1)
    loss = output - out_y + margin
    onehot = jax.nn.one_hot(y, C, dtype=bool)
    loss = jnp.where(onehot, 0.0, loss)
    loss = jnp.maximum(loss, 0.0)
    if p != 1:
        loss = loss ** p
    if weight is not None:
        loss = loss * weight
    loss = jnp.sum(loss)
    if size_average:
        loss = loss / N
    return loss


if __name__ == "__main__":
    key = jax.random.PRNGKey(0)
    k1, k2, k3, k4, k5 = jax.random.split(key, 5)

    # Case 1: PyTorch defaults (p=1, margin=1, no weight). C=32 -> lane-packed
    # path (k=4, W=128), hoisted E/Et, factored out_y matmuls.
    N1, C1 = 16, 32
    out1 = jax.random.normal(k1, (N1, C1), dtype=jnp.float32)
    y1 = jax.random.randint(k2, (N1,), 0, C1, dtype=jnp.int32)
    got1 = jax.block_until_ready(
        multi_class_hinge_loss(out1, y1, p=1, margin=1.0, weight=None,
                               size_average=True))
    ref1 = _reference(out1, y1)
    assert jnp.allclose(got1, ref1, rtol=1e-5, atol=1e-5), (got1, ref1)

    # Case 2: ragged N, C not dividing 128 (unpacked, MXU-free path), p=2,
    # per-class weight, bf16 activations kept bf16 in HBM and cast per-tile.
    N2, C2 = 13, 10
    out2 = jax.random.normal(k3, (N2, C2), dtype=jnp.float32).astype(jnp.bfloat16)
    y2 = jax.random.randint(k4, (N2,), 0, C2, dtype=jnp.int32)
    w2 = jax.random.uniform(k5, (C2,), dtype=jnp.float32) + 0.5
    got2 = jax.block_until_ready(
        multi_class_hinge_loss(out2, y2, p=2, margin=1.0, weight=w2,
                               size_average=True))
    ref2 = _reference(out2.astype(jnp.float32), y2, p=2, margin=1.0, weight=w2)
    assert jnp.allclose(got2, ref2, rtol=1e-4, atol=1e-4), (got2, ref2)

    print("KERNEL_OK")
</pallas_src>

<mosaic_0001>
module attributes {stable_mosaic.version = 11 : i64} {
  func.func @_hinge_kernel_packed(%arg0: i32, %arg1: memref<8x128xf32, #tpu.memory_space<vmem>>, %arg2: memref<8x4xi32, #tpu.memory_space<vmem>>, %arg3: memref<4x128xf32, #tpu.memory_space<vmem>>, %arg4: memref<128x4xf32, #tpu.memory_space<vmem>>, %arg5: memref<1x128xf32, #tpu.memory_space<vmem>>) attributes {dimension_semantics = [#tpu.dimension_semantics<parallel>], iteration_bounds = array<i64: 1>, scalar_prefetch = 0 : i64, scratch_operands = 0 : i64, tpu.core_type = #tpu.core_type<tc>, window_params = [{transform_indices = @transform_0, window_bounds = array<i64: 8, 128>}, {transform_indices = @transform_1, window_bounds = array<i64: 8, 4>}, {pipeline_mode = #tpu.pipeline_mode<synchronous>, transform_indices = @transform_2, window_bounds = array<i64: 4, 128>}, {pipeline_mode = #tpu.pipeline_mode<synchronous>, transform_indices = @transform_3, window_bounds = array<i64: 128, 4>}, {transform_indices = @transform_4, window_bounds = array<i64: 1, 128>}]} {
    %c0 = arith.constant 0 : index
    %c0_0 = arith.constant 0 : index
    %0 = vector.load %arg1[%c0, %c0_0] : memref<8x128xf32, #tpu.memory_space<vmem>>, vector<8x128xf32>
    %c0_1 = arith.constant 0 : index
    %c0_2 = arith.constant 0 : index
    %1 = vector.load %arg3[%c0_1, %c0_2] : memref<4x128xf32, #tpu.memory_space<vmem>>, vector<4x128xf32>
    %c0_3 = arith.constant 0 : index
    %c0_4 = arith.constant 0 : index
    %2 = vector.load %arg4[%c0_3, %c0_4] : memref<128x4xf32, #tpu.memory_space<vmem>>, vector<128x4xf32>
    %c0_5 = arith.constant 0 : index
    %c0_6 = arith.constant 0 : index
    %3 = vector.load %arg2[%c0_5, %c0_6] : memref<8x4xi32, #tpu.memory_space<vmem>>, vector<8x4xi32>
    %4 = arith.sitofp %3 : vector<8x4xi32> to vector<8x4xf32>
    %5 = tpu.iota {dimensions = array<i32: 1>} : vector<1x128xi32>
    %c32_i32 = arith.constant 32 : i32
    %c0_i32 = arith.constant 0 : i32
    %6 = arith.cmpi eq, %c32_i32, %c0_i32 : i32
    %c1_i32 = arith.constant 1 : i32
    %7 = arith.select %6, %c1_i32, %c32_i32 : i32
    %8 = vector.broadcast %7 : i32 to vector<1x128xi32>
    %9 = arith.remsi %5, %8 : vector<1x128xi32>
    %c0_i32_7 = arith.constant 0 : i32
    %10 = vector.broadcast %c0_i32_7 : i32 to vector<1x128xi32>
    %11 = arith.cmpi ne, %9, %10 : vector<1x128xi32>
    %c0_i32_8 = arith.constant 0 : i32
    %12 = vector.broadcast %c0_i32_8 : i32 to vector<1x128xi32>
    %13 = arith.cmpi slt, %9, %12 : vector<1x128xi32>
    %c0_i32_9 = arith.constant 0 : i32
    %14 = arith.cmpi slt, %7, %c0_i32_9 : i32
    %15 = vector.broadcast %14 : i1 to vector<1x128xi1>
    %16 = vector.broadcast %15 : vector<1x128xi1> to vector<1x128xi1>
    %17 = arith.xori %13, %16 : vector<1x128xi1>
    %18 = arith.andi %17, %11 : vector<1x128xi1>
    %19 = vector.broadcast %7 : i32 to vector<1x128xi32>
    %20 = arith.addi %9, %19 : vector<1x128xi32>
    %21 = arith.select %18, %20, %9 : vector<1x128xi1>, vector<1x128xi32>
    %22 = arith.sitofp %21 : vector<1x128xi32> to vector<1x128xf32>
    %cst = arith.constant dense<0.000000e+00> : vector<8x128xf32>
    %23 = tpu.matmul %4, %1, %cst {dimension_numbers = #tpu.dot_dimension_numbers<[1], [0], [0], [1], [0, 0, 1, 1], [], []>} : vector<8x4xf32>, vector<4x128xf32>, vector<8x128xf32> -> vector<8x128xf32>
    %24 = vector.broadcast %22 : vector<1x128xf32> to vector<8x128xf32>
    %25 = arith.cmpf oeq, %24, %23 : vector<8x128xf32>
    %cst_10 = arith.constant 0.000000e+00 : f32
    %26 = vector.broadcast %cst_10 : f32 to vector<8x128xf32>
    %27 = arith.select %25, %0, %26 : vector<8x128xi1>, vector<8x128xf32>
    %cst_11 = arith.constant dense<0.000000e+00> : vector<8x4xf32>
    %28 = tpu.matmul %27, %2, %cst_11 {dimension_numbers = #tpu.dot_dimension_numbers<[1], [0], [0], [1], [0, 0, 1, 1], [], []>, precision = #tpu.contract_precision<fp32>} : vector<8x128xf32>, vector<128x4xf32>, vector<8x4xf32> -> vector<8x4xf32>
    %cst_12 = arith.constant dense<0.000000e+00> : vector<8x128xf32>
    %29 = tpu.matmul %28, %1, %cst_12 {dimension_numbers = #tpu.dot_dimension_numbers<[1], [0], [0], [1], [0, 0, 1, 1], [], []>, precision = #tpu.contract_precision<fp32>} : vector<8x4xf32>, vector<4x128xf32>, vector<8x128xf32> -> vector<8x128xf32>
    %30 = arith.subf %0, %29 : vector<8x128xf32>
    %cst_13 = arith.constant 1.000000e+00 : f32
    %31 = vector.broadcast %cst_13 : f32 to vector<8x128xf32>
    %32 = arith.addf %30, %31 : vector<8x128xf32>
    %cst_14 = arith.constant 0.000000e+00 : f32
    %33 = vector.broadcast %cst_14 : f32 to vector<8x128xf32>
    %34 = arith.select %25, %33, %32 : vector<8x128xi1>, vector<8x128xf32>
    %cst_15 = arith.constant 0.000000e+00 : f32
    %35 = vector.broadcast %cst_15 : f32 to vector<8x128xf32>
    %36 = arith.maximumf %34, %35 : vector<8x128xf32>
    %cst_16 = arith.constant dense<0.000000e+00> : vector<128xf32>
    %37 = vector.multi_reduction <add>, %36, %cst_16 [0] : vector<8x128xf32> to vector<128xf32>
    %38 = vector.shape_cast %37 : vector<128xf32> to vector<1x128xf32>
    %c0_17 = arith.constant 0 : index
    %c0_18 = arith.constant 0 : index
    %39 = vector.load %arg5[%c0_17, %c0_18] : memref<1x128xf32, #tpu.memory_space<vmem>>, vector<1x128xf32>
    tpu.vector_store %arg5[%c0_17, %c0_18], %38 {strides = array<i32>} : memref<1x128xf32, #tpu.memory_space<vmem>>, vector<1x128xf32>,
    return
  }
  func.func @transform_0(%arg0: i32) -> (i32, i32) {
    %c0_i32 = arith.constant 0 : i32
    %c0_i32_0 = arith.constant 0 : i32
    return %arg0, %c0_i32 : i32, i32
  }
  func.func @transform_1(%arg0: i32) -> (i32, i32) {
    %c0_i32 = arith.constant 0 : i32
    %c0_i32_0 = arith.constant 0 : i32
    return %arg0, %c0_i32 : i32, i32
  }
  func.func @transform_2(%arg0: i32) -> (i32, i32) {
    %c0_i32 = arith.constant 0 : i32
    %c0_i32_0 = arith.constant 0 : i32
    %c0_i32_1 = arith.constant 0 : i32
    return %c0_i32, %c0_i32_0 : i32, i32
  }
  func.func @transform_3(%arg0: i32) -> (i32, i32) {
    %c0_i32 = arith.constant 0 : i32
    %c0_i32_0 = arith.constant 0 : i32
    %c0_i32_1 = arith.constant 0 : i32
    return %c0_i32, %c0_i32_0 : i32, i32
  }
  func.func @transform_4(%arg0: i32) -> (i32, i32) {
    %c0_i32 = arith.constant 0 : i32
    %c0_i32_0 = arith.constant 0 : i32
    return %arg0, %c0_i32 : i32, i32
  }
}

</mosaic_0001>

<bundles_post_ra>
// kernel: tpu_custom_call.1
= control target key start
LH: loop header
LB: loop body
LE: loop exit
PB: predicated region body
PF: predicated region fallthrough
CT: control target
= control target key end

     0   :  { %vm57_vm0 = vcmask 1043456   ;;  %v1801_v2 = vmov 0.0   ;;  %vm1802_vm1 = vmmov 0   ;;  %vm53_vm2 = vcmask 31744   ;;  %s2187_s0 = inlined_call_operand.vmem [shape: f32[8,128], index: 0, kind: input, shape index: {}]   ;;  %s2188_s1 = inlined_call_operand.vmem [shape: s32[8,4], index: 1, kind: input, shape index: {}]   ;;  %s2189_s2 = inlined_call_operand.vmem [shape: f32[4,128], index: 2, kind: input, shape index: {}]   ;;  %s2190_s3 = inlined_call_operand.vmem [shape: f32[128,4], index: 3, kind: input, shape index: {}]   ;;  %s2191_s4 = inlined_call_operand.hbm [shape: f32[1,128], index: 4, kind: output, shape index: {}]  }
   0x1   :  { %v19_v0 = vld [vmem:[%s2189_s2] sm:$0xf]  ;;  %1366 = vmatprep.subr.mxu0 %v1801_v2  ;;  %1368 = vmatprep.mubr.msk.f32.mxu0 %vm1802_vm1, %v1801_v2  ;;  %v21_v6 = vld [vmem:[%s2190_s3 + $0x8] sm:$0xff]  ;;  %v22_v7 = vld [vmem:[%s2190_s3 + $0x10] sm:$0xff]  ;;  %v1803_v8 = vmov 0.0|0.0  }
   0x2   :  { %v36_v1 = vld [vmem:[%s2188_s1] sm:$0xff]  ;;  %v1837_v3 = vsel %vm57_vm0, %v19_v0, 0  ;;  %1367 = vmatpush3.msk.msra.mxu0 %vm57_vm0, %v19_v0  ;;  %1683 = vmatprep.subr.bf16.mxu1 %v1803_v8  ;;  %v137_v10 = vand.u32 4294901760, %v21_v6  ;;  %v23_v11 = vld [vmem:[%s2190_s3 + $0x18] sm:$0xff]  ;;  %v140_v12 = vand.u32 4294901760, %v22_v7  ;;  %v25_v15 = vld [vmem:[%s2190_s3 + $0x28] sm:$0xff] }
   0x3   :  { %v37_v4 = vcvt.s32.f32 %v36_v1  ;;  %v20_v5 = vld [vmem:[%s2190_s3] sm:$0xff]  ;;  %1611 = vmatprep.subr.bf16.mxu0 %v1803_v8  ;;  %v143_v14 = vand.u32 4294901760, %v23_v11  ;;  %v26_v16 = vld [vmem:[%s2190_s3 + $0x30] sm:$0xff]  ;;  %v27_v17 = vld [vmem:[%s2190_s3 + $0x38] sm:$0xff]  ;;  %1508 = vmatprep.mubr.msk.f32.mxu1 %vm1802_vm1, %v1801_v2  ;;  %v149_v26 = vand.u32 4294901760, %v25_v15 }
   0x4   :  { %v134_v9 = vand.u32 4294901760, %v20_v5  ;;  %v24_v13 = vld [vmem:[%s2190_s3 + $0x20] sm:$0xff]  ;;  %v1872_v20 = vsub.f32 %v21_v6, %v137_v10  ;;  %v29_v23 = vld [vmem:[%s2190_s3 + $0x48] sm:$0xff]  ;;  %v1882_v24 = vsub.f32 %v22_v7, %v140_v12  ;;  %v30_v27 = vld [vmem:[%s2190_s3 + $0x50] sm:$0xff] }
   0x5   :  { %1369 = vmatmul.mubr.msk.f32.vlgmr.msra.gmra.mrb[0].mxu0 %vm53_vm2, %v37_v4  ;;  %v146_v21 = vand.u32 4294901760, %v24_v13  ;;  %v28_v22 = vld [vmem:[%s2190_s3 + $0x40] sm:$0xff]  ;;  %v1884_v25 = vsub.f32 %v23_v11, %v143_v14 }
   0x6   :  { %v1868_v18 = vpack.c.bf16 %v137_v10, %v134_v9  ;;  %v1870_v19 = vsub.f32 %v20_v5, %v134_v9  ;;  %1403 = vmatprep.mubr.msk.f32.mxu0 %vm1802_vm1, %v1801_v2 }
   0x7   :  { %9 = vsyncpa [#allocation3], 0  ;;  %v1893_v28 = vpack.c.bf16 %v143_v14, %v140_v12  ;;  %v1895_v29 = vsub.f32 %v24_v13, %v146_v21  ;;  %v152_v30 = vand.u32 4294901760, %v26_v16  ;;  %v155_v31 = vand.u32 4294901760, %v27_v17  ;;  %v31_v32 = vld [vmem:[%s2190_s3 + $0x58] sm:$0xff]  ;;  %v32_v48 = vld [vmem:[%s2190_s3 + $0x60] sm:$0xff] }
   0x8   :  { %1685 = vmatpush3.bf16.msra.mxu1 %v1868_v18  ;;  %1613 = vmatpush3.bf16.msra.mxu0 %v1868_v18  ;;  %v1902_v33 = vsub.f32 %v25_v15, %v149_v26  ;;  %v158_v34 = vand.u32 4294901760, %v28_v22  ;;  %v161_v35 = vand.u32 4294901760, %v29_v23  ;;  %v164_v38 = vand.u32 4294901760, %v30_v27  ;;  %v33_v49 = vld [vmem:[%s2190_s3 + $0x68] sm:$0xff]  ;;  %v34_v53 = vld [vmem:[%s2190_s3 + $0x70] sm:$0xff]  ;;  %v35_v54 = vld [vmem:[%s2190_s3 + $0x78] sm:$0xff] }
   0x9   :  { %1686 = vmatprep.subr.bf16.mxu1 %v1803_v8  ;;  %1614 = vmatprep.subr.bf16.mxu0 %v1803_v8  ;;  %v1904_v36 = vsub.f32 %v26_v16, %v152_v30  ;;  %v1906_v37 = vsub.f32 %v27_v17, %v155_v31  ;;  %v167_v41 = vand.u32 4294901760, %v31_v32  ;;  %v1914_v42 = vpack.c.bf16 %v149_v26, %v146_v21 }
   0xa   :  { %v1908_v39 = vsub.f32 %v28_v22, %v158_v34  ;;  %v1910_v40 = vsub.f32 %v29_v23, %v161_v35  ;;  %v1916_v43 = vsub.f32 %v30_v27, %v164_v38  ;;  %v1924_v45 = vpack.c.bf16 %v155_v31, %v152_v30 }
   0xb   :  { %v1920_v44 = vsub.f32 %v31_v32, %v167_v41  ;;  %v1930_v46 = vpack.c.bf16 %v161_v35, %v158_v34  ;;  %v1936_v47 = vpack.c.bf16 %v167_v41, %v164_v38  ;;  %v170_v50 = vand.u32 4294901760, %v32_v48 }
   0xc   :  { %1688 = vmatpush3.bf16.msra.mxu1 %v1893_v28  ;;  %1616 = vmatpush3.bf16.msra.mxu0 %v1893_v28  ;;  %v173_v51 = vand.u32 4294901760, %v33_v49  ;;  %v176_v55 = vand.u32 4294901760, %v34_v53  ;;  %v179_v56 = vand.u32 4294901760, %v35_v54  ;;  %v227_v62 = vand.u32 4294901760, %v1870_v19 }
   0xd   :  { %1689 = vmatprep.subr.bf16.mxu1 %v1803_v8  ;;  %1617 = vmatprep.subr.bf16.mxu0 %v1803_v8  ;;  %v1964_v58 = vsub.f32 %v32_v48, %v170_v50  ;;  %v234_v63 = vand.u32 4294901760, %v1872_v20  ;;  %v241_v7 = vand.u32 4294901760, %v1882_v24  ;;  %v248_v9 = vand.u32 4294901760, %v1884_v25 }
   0xe   :  { %v1950_v52 = vpack.c.bf16 %v173_v51, %v170_v50  ;;  %v1962_v57 = vpack.c.bf16 %v179_v56, %v176_v55  ;;  %v1966_v59 = vsub.f32 %v33_v49, %v173_v51  ;;  %v1968_v60 = vsub.f32 %v34_v53, %v176_v55 }
   0xf   :  { %v1970_v61 = vsub.f32 %v35_v54, %v179_v56  ;;  %v1978_v0 = vpack.c.bf16 %v234_v63, %v227_v62  ;;  %v228_v1 = vsub.f32 %v1870_v19, %v227_v62  ;;  %v235_v4 = vsub.f32 %v1872_v20, %v234_v63 }
  0x10   :  { %1691 = vmatpush3.bf16.msra.mxu1 %v1914_v42  ;;  %1619 = vmatpush3.bf16.msra.mxu0 %v1914_v42  ;;  %v1986_v11 = vpack.c.bf16 %v248_v9, %v241_v7  ;;  %v242_v12 = vsub.f32 %v1882_v24, %v241_v7  ;;  %v249_v13 = vsub.f32 %v1884_v25, %v248_v9  ;;  %v255_v16 = vand.u32 4294901760, %v1895_v29 }
  0x11   :  { %1692 = vmatprep.subr.bf16.mxu1 %v1803_v8  ;;  %1620 = vmatprep.subr.bf16.mxu0 %v1803_v8  ;;  %v229_v5 = vand.u32 4294901760, %v228_v1  ;;  %v236_v6 = vand.u32 4294901760, %v235_v4  ;;  %v262_v17 = vand.u32 4294901760, %v1902_v33  ;;  %v269_v31 = vand.u32 4294901760, %v1904_v36 }
  0x12   :  { %v243_v14 = vand.u32 4294901760, %v242_v12  ;;  %v250_v15 = vand.u32 4294901760, %v249_v13  ;;  %v256_v23 = vsub.f32 %v1895_v29, %v255_v16  ;;  %v276_v32 = vand.u32 4294901760, %v1906_v37 }
  0x13   :  { %v1984_v10 = vpack.c.bf16 %v236_v6, %v229_v5  ;;  %v1994_v22 = vpack.c.bf16 %v262_v17, %v255_v16  ;;  %v263_v26 = vsub.f32 %v1902_v33, %v262_v17  ;;  %v270_v38 = vsub.f32 %v1904_v36, %v269_v31 }
  0x14   :  { %1694 = vmatpush3.bf16.msra.mxu1 %v1924_v45  ;;  %1622 = vmatpush3.bf16.msra.mxu0 %v1924_v45  ;;  %v1992_v21 = vpack.c.bf16 %v250_v15, %v243_v14  ;;  %v257_v27 = vand.u32 4294901760, %v256_v23  ;;  %v2002_v35 = vpack.c.bf16 %v276_v32, %v269_v31  ;;  %v277_v41 = vsub.f32 %v1906_v37, %v276_v32 }
  0x15   :  { %1695 = vmatprep.subr.bf16.mxu1 %v1803_v8  ;;  %1623 = vmatprep.subr.bf16.mxu0 %v1803_v8  ;;  %v264_v30 = vand.u32 4294901760, %v263_v26  ;;  %v271_v48 = vand.u32 4294901760, %v270_v38  ;;  %v283_v50 = vand.u32 4294901760, %v1908_v39  ;;  %v290_v51 = vand.u32 4294901760, %v1910_v40 }
  0x16   :  { %v278_v49 = vand.u32 4294901760, %v277_v41  ;;  %v297_v1 = vand.u32 4294901760, %v1916_v43  ;;  %v304_v4 = vand.u32 4294901760, %v1920_v44  ;;  %v311_v14 = vand.u32 4294901760, %v1964_v58 }
  0x17   :  { %v2000_v34 = vpack.c.bf16 %v264_v30, %v257_v27  ;;  %v2010_v54 = vpack.c.bf16 %v290_v51, %v283_v50  ;;  %v284_v55 = vsub.f32 %v1908_v39, %v283_v50  ;;  %v291_v56 = vsub.f32 %v1910_v40, %v290_v51 }
  0x18   :  { %1697 = vmatpush3.bf16.msra.mxu1 %v1930_v46  ;;  %1625 = vmatpush3.bf16.msra.mxu0 %v1930_v46  ;;  %v2008_v53 = vpack.c.bf16 %v278_v49, %v271_v48  ;;  %v2018_v6 = vpack.c.bf16 %v304_v4, %v297_v1  ;;  %v298_v7 = vsub.f32 %v1916_v43, %v297_v1  ;;  %v318_v15 = vand.u32 4294901760, %v1966_v59 }
  0x19   :  { %1698 = vmatprep.subr.bf16.mxu1 %v1803_v8  ;;  %1626 = vmatprep.subr.bf16.mxu0 %v1803_v8  ;;  %v285_v62 = vand.u32 4294901760, %v284_v55  ;;  %v292_v63 = vand.u32 4294901760, %v291_v56  ;;  %v305_v9 = vsub.f32 %v1920_v44, %v304_v4  ;;  %v312_v23 = vsub.f32 %v1964_v58, %v311_v14 }
  0x1a   :  { %v299_v12 = vand.u32 4294901760, %v298_v7  ;;  %v1726_v17 = vpack.c.bf16 %v318_v15, %v311_v14  ;;  %v319_v26 = vsub.f32 %v1966_v59, %v318_v15  ;;  %v325_v31 = vand.u32 4294901760, %v1968_v60  ;;  %v2051_v15 = vld [vmem:[%s2187_s0] sm:$0xff]  ;;  %s1804_s0 = smov [#allocation2]  }
  0x1b   :  { %v2016_v5 = vpack.c.bf16 %v292_v63, %v285_v62  ;;  %v306_v13 = vand.u32 4294901760, %v305_v9  ;;  %v313_v27 = vand.u32 4294901760, %v312_v23  ;;  %v332_v32 = vand.u32 4294901760, %v1970_v61  ;;  %s1240_s22 = sshll.u32 %s1804_s0, 4  ;;  %s1241_s22 = int_to_ptr.vmem [resolvable:$true] %s1240_s22 }
  0x1c   :  { %1700 = vmatpush3.bf16.msra.mxu1 %v1936_v47  ;;  %1628 = vmatpush3.bf16.msra.mxu0 %v1936_v47  ;;  %v320_v30 = vand.u32 4294901760, %v319_v26  ;;  %v326_v48 = vsub.f32 %v1968_v60, %v325_v31  ;;  %v1660_v56 = vpack.c.bf16 %v1872_v20, %v1870_v19  ;;  %v1663_v62 = vpack.c.bf16 %v1884_v25, %v1882_v24  ;;  %s1777_s23 = scalar_lea.vmem %s1241_s22, 16  ;;  %s1781_s24 = scalar_lea.vmem %s1241_s22, 32 }
  0x1d   :  { %1701 = vmatprep.subr.bf16.mxu1 %v1803_v8  ;;  %1629 = vmatprep.subr.bf16.mxu0 %v1803_v8  ;;  %v1651_v16 = vpack.c.bf16 %v306_v13, %v299_v12  ;;  %v1729_v41 = vpack.c.bf16 %v332_v32, %v325_v31  ;;  %v333_v49 = vsub.f32 %v1970_v61, %v332_v32  ;;  %v38_v20 = vlaneseq  ;;  %p1778_p0 = scmp.ne.s32.totalorder %s1241_s22, %s1777_s23  ;;  %p1782_p1 = scmp.lt.s32.totalorder %s1241_s22, %s1241_s22 }
  0x1e   :  { %v1654_v38 = vpack.c.bf16 %v320_v30, %v313_v27  ;;  %v327_v50 = vand.u32 4294901760, %v326_v48  ;;  %v1666_v63 = vpack.c.bf16 %v1902_v33, %v1895_v29  ;;  %v1669_v1 = vpack.c.bf16 %v1906_v37, %v1904_v36  ;;  %p1783_p2 = scmp.lt.s32.totalorder %s1781_s24, %s1777_s23 }
  0x1f   :  { %v334_v51 = vand.u32 4294901760, %v333_v49  ;;  %v1672_v4 = vpack.c.bf16 %v1910_v40, %v1908_v39  ;;  %v1675_v7 = vpack.c.bf16 %v1920_v44, %v1916_v43  ;;  %v1678_v9 = vpack.c.bf16 %v1966_v59, %v1964_v58 }
  0x20   :  { %1703 = vmatpush3.bf16.msra.mxu1 %v1950_v52  ;;  %1631 = vmatpush3.bf16.msra.mxu0 %v1950_v52  ;;  %v1681_v19 = vpack.c.bf16 %v1970_v61, %v1968_v60  ;;  %v39_v12 = vand.u32 127, %v38_v20  ;;  %p1784_p3 = por %p1783_p2, %p1782_p1 }
  0x21   :  { %1704 = vmatprep.subr.bf16.mxu1 %v1803_v8  ;;  %1632 = vmatprep.subr.bf16.mxu0 %v1803_v8  ;;  %v1657_v55 = vpack.c.bf16 %v334_v51, %v327_v50 }
  0x22   :  { %v44_v13 = vand.u32 31, %v39_v12  ;;  %p1785_p4 = pnand %p1784_p3, %p1778_p0 }
  0x24   :  { %1706 = vmatpush3.bf16.msra.mxu1 %v1962_v57  ;;  %1634 = vmatpush3.bf16.msra.mxu0 %v1962_v57  ;;  %v2046_v14 = vcvt.s32.f32 %v44_v13 }
  0x25   :  { %1707 = vmatprep.subr.bf16.mxu1 %v1803_v8  ;;  %1635 = vmatprep.subr.bf16.mxu0 %v1803_v8 }
  0xd8   :  { %v2053_v23 = vpop.f32.mrb[0].mxu0 }
  0xd9   :  { %vm131_vm3 = vcmp.eq.f32.partialorder %v2046_v14, %v2053_v23  ;;  %v1370_v26 = vpop.f32.mrb[1].mxu0 }
  0xda   :  { %v132_v27 = vsel %vm131_vm3, %v2051_v15, 0.0 }
  0xdb   :  { %v2061_v30 = vand.u32 4294901760, %v132_v27 }
  0xdd   :  { %v2064_v31 = vsub.f32 %v132_v27, %v2061_v30 }
  0xdf   :  { %v216_v32 = vand.u32 4294901760, %v2064_v31 }
  0xe1   :  { %v217_v48 = vsub.f32 %v2064_v31, %v216_v32  ;;  %1509 = vmatmul.mubr.f32.vlgmr.msra.gmra.mrb[0].mxu1 %v216_v32 }
  0xe2   :  { %1709 = vmatpush3.bf16.msra.mxu1 %v1978_v0  ;;  %1543 = vmatprep.mubr.msk.f32.mxu1 %vm1802_vm1, %v1801_v2 }
  0xe3   :  { %v218_v49 = vand.u32 4294901760, %v217_v48  ;;  %1710 = vmatprep.subr.bf16.mxu1 %v1803_v8 }
  0xe5   :  { %1404 = vmatmul.mubr.f32.vlgmr.msra.gmra.mrb[2].mxu0 %v218_v49 }
  0xe6   :  { %1637 = vmatpush3.bf16.msra.mxu0 %v1984_v10  ;;  %1712 = vmatpush3.bf16.msra.mxu1 %v1986_v11 }
  0xe7   :  { %1638 = vmatprep.subr.bf16.mxu0 %v1803_v8  ;;  %1713 = vmatprep.subr.bf16.mxu1 %v1803_v8 }
  0xe8   :  { %1438 = vmatprep.mubr.msk.f32.mxu0 %vm1802_vm1, %v1801_v2 }
  0xea   :  { %1640 = vmatpush3.bf16.msra.mxu0 %v1992_v21  ;;  %1715 = vmatpush3.bf16.msra.mxu1 %v1994_v22 }
  0xeb   :  { %1641 = vmatprep.subr.bf16.mxu0 %v1803_v8  ;;  %1716 = vmatprep.subr.bf16.mxu1 %v1803_v8 }
  0xee   :  { %1643 = vmatpush3.bf16.msra.mxu0 %v2000_v34  ;;  %1718 = vmatpush3.bf16.msra.mxu1 %v2002_v35 }
  0xef   :  { %1644 = vmatprep.subr.bf16.mxu0 %v1803_v8  ;;  %1719 = vmatprep.subr.bf16.mxu1 %v1803_v8 }
  0xf2   :  { %1646 = vmatpush3.bf16.msra.mxu0 %v2008_v53  ;;  %1721 = vmatpush3.bf16.msra.mxu1 %v2010_v54 }
  0xf3   :  { %1647 = vmatprep.subr.bf16.mxu0 %v1803_v8  ;;  %1722 = vmatprep.subr.bf16.mxu1 %v1803_v8 }
  0xf6   :  { %1649 = vmatpush3.bf16.msra.mxu0 %v2016_v5  ;;  %1724 = vmatpush3.bf16.msra.mxu1 %v2018_v6 }
  0xf7   :  { %1650 = vmatprep.subr.bf16.mxu0 %v1803_v8  ;;  %1725 = vmatprep.subr.bf16.mxu1 %v1803_v8 }
  0xfa   :  { %1652 = vmatpush3.bf16.msra.mxu0 %v1651_v16  ;;  %1727 = vmatpush3.bf16.msra.mxu1 %v1726_v17 }
  0xfb   :  { %1653 = vmatprep.subr.bf16.mxu0 %v1803_v8  ;;  %1728 = vmatprep.subr.bf16.mxu1 %v1803_v8 }
  0xfe   :  { %1655 = vmatpush3.bf16.msra.mxu0 %v1654_v38  ;;  %1730 = vmatpush3.bf16.msra.mxu1 %v1729_v41 }
  0xff   :  { %1656 = vmatprep.subr.bf16.mxu0 %v1803_v8  ;;  %1731 = vmatprep.subr.bf16.mxu1 %v1803_v8 }
 0x101   :  { %1544 = vmatmul.mubr.f32.vlgmr.msra.gmra.mrb[0].mxu1 %v2061_v30 }
 0x102   :  { %1658 = vmatpush3.bf16.msra.mxu0 %v1657_v55  ;;  %1733 = vmatpush3.bf16.msra.mxu1 %v1868_v18  ;;  %v778_v18 = vand.u32 4294901760, %v1837_v3 }
 0x103   :  { %1659 = vmatprep.subr.bf16.mxu0 %v1803_v8  ;;  %1734 = vmatprep.subr.bf16.mxu1 %v1803_v8 }
 0x104   :  { %1578 = vmatprep.mubr.msk.f32.mxu1 %vm1802_vm1, %v1801_v2  ;;  %v855_v25 = vsub.f32 %v1837_v3, %v778_v18 }
 0x105   :  { %1439 = vmatmul.mubr.f32.vlgmr.msra.gmra.mrb[2].mxu0 %v2061_v30 }
 0x106   :  { %1661 = vmatpush3.bf16.msra.mxu0 %v1660_v56  ;;  %1736 = vmatpush3.bf16.msra.mxu1 %v1893_v28  ;;  %v856_v36 = vand.u32 4294901760, %v855_v25 }
 0x107   :  { %1662 = vmatprep.subr.bf16.mxu0 %v1803_v8  ;;  %1737 = vmatprep.subr.bf16.mxu1 %v1803_v8 }
 0x108   :  { %1473 = vmatprep.mubr.msk.f32.mxu0 %vm1802_vm1, %v1801_v2 }
 0x10a   :  { %1664 = vmatpush3.bf16.msra.mxu0 %v1663_v62  ;;  %1739 = vmatpush3.bf16.msra.mxu1 %v1914_v42  ;;  %v857_v42 = vsub.f32 %v855_v25, %v856_v36 }
 0x10b   :  { %1665 = vmatprep.subr.bf16.mxu0 %v1803_v8  ;;  %1740 = vmatprep.subr.bf16.mxu1 %v1803_v8 }
 0x10e   :  { %1667 = vmatpush3.bf16.msra.mxu0 %v1666_v63  ;;  %1742 = vmatpush3.bf16.msra.mxu1 %v1924_v45  ;;  %v858_v45 = vand.u32 4294901760, %v857_v42 }
 0x10f   :  { %1668 = vmatprep.subr.bf16.mxu0 %v1803_v8  ;;  %1743 = vmatprep.subr.bf16.mxu1 %v1803_v8 }
 0x112   :  { %1670 = vmatpush3.bf16.msra.mxu0 %v1669_v1  ;;  %1745 = vmatpush3.bf16.msra.mxu1 %v1930_v46 }
 0x113   :  { %1671 = vmatprep.subr.bf16.mxu0 %v1803_v8  ;;  %1746 = vmatprep.subr.bf16.mxu1 %v1803_v8 }
 0x116   :  { %1673 = vmatpush3.bf16.msra.mxu0 %v1672_v4  ;;  %1748 = vmatpush3.bf16.msra.mxu1 %v1936_v47 }
 0x117   :  { %1674 = vmatprep.subr.bf16.mxu0 %v1803_v8  ;;  %1749 = vmatprep.subr.bf16.mxu1 %v1803_v8 }
 0x11a   :  { %1676 = vmatpush3.bf16.msra.mxu0 %v1675_v7  ;;  %1751 = vmatpush3.bf16.msra.mxu1 %v1950_v52 }
 0x11b   :  { %1677 = vmatprep.subr.bf16.mxu0 %v1803_v8  ;;  %1752 = vmatprep.subr.bf16.mxu1 %v1803_v8 }
 0x11e   :  { %1679 = vmatpush3.bf16.msra.mxu0 %v1678_v9  ;;  %1754 = vmatpush3.bf16.msra.mxu1 %v1962_v57 }
 0x11f   :  { %1680 = vmatprep.subr.bf16.mxu0 %v1803_v8  ;;  %1581 = vmatprep.subr.mxu1 %v1801_v2 }
 0x121   :  { %1579 = vmatmul.mubr.f32.vlgmr.msra.gmra.mrb[0].mxu1 %v2061_v30 }
 0x122   :  { %1682 = vmatpush3.bf16.msra.mxu0 %v1681_v19  ;;  %1582 = vmatpush3.msra.mxu1 %v778_v18 }
 0x123   :  { %1596 = vmatprep.subr.mxu0 %v1801_v2  ;;  %1583 = vmatprep.mubr.msk.f32.mxu1 %vm1802_vm1, %v1801_v2 }
 0x124   :  { %1586 = vmatprep.subr.mxu1 %v1801_v2 }
 0x125   :  { %1474 = vmatmul.mubr.f32.vlgmr.msra.gmra.mrb[2].mxu0 %v2064_v31 }
 0x126   :  { %1597 = vmatpush3.msra.mxu0 %v778_v18  ;;  %1598 = vmatprep.mubr.msk.f32.mxu0 %vm1802_vm1, %v1801_v2 }
 0x127   :  { %1601 = vmatprep.subr.mxu0 %v1801_v2 }
 0x1f4   :  { %v770_v8 = vpop.f32.mrb[0].mxu1 }
 0x1f5   :  { %v1580_v24 = vpop.f32.mrb[1].mxu1 }
 0x1f8   :  { %v475_v28 = vpop.f32.mrb[2].mxu0 }
 0x1f9   :  { %v1755_v29 = vadd.f32 %v770_v8, %v475_v28  ;;  %v1475_v33 = vpop.f32.mrb[3].mxu0 }
 0x1fb   :  { %v775_v37 = vsel %vm53_vm2, %v1755_v29, 0 }
 0x1fc   :  { %v843_v39 = vand.u32 4294901760, %v775_v37 }
 0x1fe   :  { %v844_v40 = vsub.f32 %v775_v37, %v843_v39 }
 0x200   :  { %v845_v43 = vand.u32 4294901760, %v844_v40 }
 0x202   :  { %1599 = vmatmul.mubr.f32.vlgmr.msra.gmra.mrb[4].mxu0 %v845_v43  ;;  %v846_v44 = vsub.f32 %v844_v40, %v845_v43 }
 0x203   :  { %1602 = vmatpush3.msra.mxu0 %v856_v36  ;;  %1603 = vmatprep.mubr.msk.f32.mxu0 %vm1802_vm1, %v1801_v2 }
 0x204   :  { %v847_v46 = vand.u32 4294901760, %v846_v44  ;;  %1606 = vmatprep.subr.mxu0 %v1801_v2 }
 0x206   :  { %1584 = vmatmul.mubr.f32.vlgmr.msra.gmra.mrb[2].mxu1 %v847_v46 }
 0x207   :  { %1587 = vmatpush3.msra.mxu1 %v858_v45  ;;  %1588 = vmatprep.mubr.msk.f32.mxu1 %vm1802_vm1, %v1801_v2 }
 0x208   :  { %1591 = vmatprep.subr.mxu1 %v1801_v2 }
 0x20a   :  { %1604 = vmatmul.mubr.f32.vlgmr.msra.gmra.mrb[4].mxu0 %v843_v39 }
 0x20b   :  { %1607 = vmatpush3.msra.mxu0 %v778_v18  ;;  %1608 = vmatprep.mubr.msk.f32.mxu0 %vm1802_vm1, %v1801_v2 }
 0x20e   :  { %1589 = vmatmul.mubr.f32.vlgmr.msra.gmra.mrb[2].mxu1 %v843_v39 }
 0x20f   :  { %1592 = vmatpush3.msra.mxu1 %v855_v25  ;;  %1593 = vmatprep.mubr.msk.f32.mxu1 %vm1802_vm1, %v1801_v2 }
 0x212   :  { %1609 = vmatmul.mubr.f32.vlgmr.msra.gmra.mrb[4].mxu0 %v843_v39 }
 0x216   :  { %1594 = vmatmul.mubr.f32.vlgmr.msra.gmra.mrb[2].mxu1 %v844_v40 }
 0x2e5   :  { %v1219_v3 = vpop.f32.mrb[4].mxu0 }
 0x2e6   :  { %v1610_v47 = vpop.f32.mrb[5].mxu0 }
 0x2e9   :  { %v999_v52 = vpop.f32.mrb[2].mxu1 }
 0x2ea   :  { %v1756_v57 = vadd.f32 %v1219_v3, %v999_v52  ;;  %v1595_v58 = vpop.f32.mrb[3].mxu1 }
 0x2ec   :  { %v1223_v59 = vsub.f32 %v2051_v15, %v1756_v57 }
 0x2ee   :  { %v1224_v60 = vadd.f32 1.0, %v1223_v59 }
 0x2f0   :  { %v1225_v61 = vsel %vm131_vm3, 0.0, %v1224_v60 }
 0x2f1   :  { %v1226_v0 = vmax.f32 %v1225_v61, 0.0 }
 0x2f3   :  { %v1227_v10 = vrot.slane %v1226_v0, 4 }
 0x2f5   :  { %v1228_v11 = vadd.f32 %v1227_v10, %v1226_v0 }
 0x2f7   :  { %v1229_v21 = vrot.slane %v1228_v11, 2 }
 0x2f9   :  { %v1230_v22 = vadd.f32 %v1229_v21, %v1228_v11 }
 0x2fb   :  { %v1231_v2 = vrot.slane %v1230_v22, 1 }
 0x2fd   :  { %v1232_v34 = vadd.f32 %v1231_v2, %v1230_v22 }
 0x2ff   :  { %1233 = vst [vmem:[#allocation2] sm:$0x1] %v1232_v34 }
 0x300   :  { %1788 = shalt.err (!%p1785_p4)
}
 0x301   :  { %s1789_s27 = scalar_lea.hbm %s2191_s4, 16 }
 0x302   :  { %p1790_p5 = scmp.ne.s32.totalorder %s2191_s4, %s1789_s27  ;;  %p1793_p6 = scmp.lt.u32.totalorder %s1789_s27, %s2191_s4 }
 0x304   :  { %p1795_p7 = pnand %p1793_p6, %p1790_p5 }
 0x306   :  { %1798 = shalt.err (!%p1795_p7)
}
 0x307   :  { %1243 = dma.vmem_to_hbm [thread:$0]  %s1241_s22, 16, %s2191_s4, [#allocation3]  }
 0x308   :  { %1799 = dma.done.wait [#allocation3], 16  }
 0x309   :  { %1800 = vsyncadd [#allocation3], 4294967280 }
 0x30a   :  { %1247 = vsyncpa [#allocation3], 1 }

</bundles_post_ra>
